<compile_context>
chip_gen: v5e
topology: v5e:2x2
jax: 0.10.0
libtpu: 0.0.40
codegen_flags: <defaults>
</compile_context>

<pallas_src>
import jax
import jax.numpy as jnp
import numpy as np
from jax import lax
from jax.experimental import pallas as pl
from jax.experimental.pallas import tpu as pltpu


def _round_up(x, m):
    return ((x + m - 1) // m) * m


def _pick_row_tile(rows):
    # MXU-friendly row tiles: 256 on v6e/v7x (2x256x256 MXU), 128 on v5e.
    # TODO(synk): prefer 128 first on v5e via pltpu.get_tpu_info().
    for t in (256, 128, 8):
        if rows % t == 0:
            return t
    return rows  # tiny problems: single full-extent block (allowed by the tiling rule)


# ---------------------------------------------------------------------------
# x @ W^T (nn.Linear, bias=False), row-tiled, weight resident across tiles.
# ---------------------------------------------------------------------------
def _linear_kernel(x_ref, w_ref, out_ref):
    # Contract last dims of both operands (MXU-native trans_b path, no in-kernel
    # transpose / XLU round trip).
    out_ref[...] = lax.dot_general(
        x_ref[...], w_ref[...],
        dimension_numbers=(((1,), (1,)), ((), ())),
        preferred_element_type=jnp.float32,
    ).astype(out_ref.dtype)


def linear_no_bias(x2d, w, *, out_dtype=jnp.float32, row_tile=None):
    rows, h_in = x2d.shape
    h_out = w.shape[0]
    tm = row_tile if row_tile is not None else _pick_row_tile(rows)
    # TODO(synk): on v7x set pltpu.CompilerParams(vmem_limit_bytes=...) and halve
    # tm if 2x double-buffered (tm,H) tiles + W no longer fit the 64 MiB VMEM.
    return pl.pallas_call(
        _linear_kernel,
        out_shape=jax.ShapeDtypeStruct((rows, h_out), out_dtype),
        grid=(rows // tm,),
        in_specs=[
            pl.BlockSpec((tm, h_in), lambda i: (i, 0)),      # row tile streams
            pl.BlockSpec((h_out, h_in), lambda i: (0, 0)),   # W resident across tiles
        ],
        out_specs=pl.BlockSpec((tm, h_out), lambda i: (i, 0)),
        compiler_params=pltpu.CompilerParams(dimension_semantics=("parallel",)),
    )(x2d, w)


# ---------------------------------------------------------------------------
# Decode-step-invariant encoder projection: enc_t = encoder_outputs @ W1^T,
# with S padded to a lane-dense multiple of 128 (done once per sequence).
# ---------------------------------------------------------------------------
def encoder_transform(encoder_outputs, w1, *, out_dtype=jnp.float32, row_tile=None):
    B, S, H = encoder_outputs.shape
    Sp = _round_up(S, 128)
    if Sp != S:
        # Pad over S once; padded positions are zero and get masked out per step.
        encoder_outputs = jnp.pad(encoder_outputs, ((0, 0), (0, Sp - S), (0, 0)))
    x2d = encoder_outputs.reshape(B * Sp, H)   # wrapper-side reshape: free layout plumbing
    enc_t = linear_no_bias(x2d, w1, out_dtype=out_dtype, row_tile=row_tile)
    return enc_t.reshape(B, Sp, H)


def decoder_transform(decoder_state, w2):
    """Once-per-decode-step dec_t = decoder_state @ W2^T for ALL batch rows."""
    return linear_no_bias(decoder_state, w2, out_dtype=jnp.float32)


# ---------------------------------------------------------------------------
# Per-decode-step kernel: tanh(enc_t + dec_t) . vt  ->  masked log-softmax.
# One grid point processes a whole batch tile (TB rows).
# ---------------------------------------------------------------------------
def _attention_step_kernel(dec_t_ref, enc_t_ref, mask_ref, vt_ref, out_ref):
    """
    dec_t_ref : (TB, H)      precomputed decoder_state @ W2^T (f32)
    enc_t_ref : (TB, Sp, H)  precomputed encoder_outputs @ W1^T (f32 or bf16)
    mask_ref  : (TB, Sp)     0/1 mask; padded S positions are 0
    vt_ref    : (1, H)
    out_ref   : (TB, Sp)     masked log-softmax scores (lane-dense store)
    """
    enc_t = enc_t_ref[...].astype(jnp.float32)   # upcast: keep tanh/softmax in f32 on all gens
    dec_t = dec_t_ref[...][:, None, :]           # (TB, 1, H), broadcast over S
    h = jnp.tanh(enc_t + dec_t)                  # VPU add + EUP tanh
    # TODO(synk): at realistic H (>=128) contract H on the MXU via lax.dot_general
    # (h x vt, contracting last dims) instead of this VPU-mul + XLU lane reduce.
    u = jnp.sum(h * vt_ref[...][None, :, :], axis=-1)           # (TB, Sp)

    # Masked log-softmax over S.  VPU select instead of EUP log(mask + eps):
    # avoids a serializing transcendental and the f32-denormal flush on TPU.
    masked = jnp.where(mask_ref[...] > 0, u, jnp.float32(-1e30))
    m = jnp.max(masked, axis=-1, keepdims=True)
    shifted = masked - m
    lse = jnp.log(jnp.sum(jnp.exp(shifted), axis=-1, keepdims=True))
    out_ref[...] = (shifted - lse).astype(out_ref.dtype)


def attention_step(dec_t, enc_t, mask, vt, *, batch_tile=None):
    """Per-decoder-step attention given precomputed enc_t (S-padded) and dec_t."""
    B, Sp, H = enc_t.shape
    S = mask.shape[-1]
    mask = mask.astype(jnp.float32)
    if Sp != S:
        mask = jnp.pad(mask, ((0, 0), (0, Sp - S)))   # padded positions masked out
    tb = batch_tile if batch_tile is not None else _pick_row_tile(B)
    out = pl.pallas_call(
        _attention_step_kernel,
        out_shape=jax.ShapeDtypeStruct((B, Sp), jnp.float32),
        grid=(B // tb,),
        in_specs=[
            pl.BlockSpec((tb, H), lambda b: (b, 0)),         # dec_t batch tile
            pl.BlockSpec((tb, Sp, H), lambda b: (b, 0, 0)),  # enc_t batch tile
            pl.BlockSpec((tb, Sp), lambda b: (b, 0)),        # mask batch tile
            pl.BlockSpec((1, H), lambda b: (0, 0)),          # vt resident
        ],
        out_specs=pl.BlockSpec((tb, Sp), lambda b: (b, 0)),
        compiler_params=pltpu.CompilerParams(dimension_semantics=("parallel",)),
    )(dec_t, enc_t, mask, vt)
    # TODO(synk): if production H stays at 32, pad H to 128 (lane-dense enc_t/h
    # vregs) — skipped here since realistic hidden sizes are already >=128.
    return out[:, :S]   # drop lane padding (wrapper-side slice)


def attention_forward(decoder_state, encoder_outputs, mask, w1, w2, vt,
                      *, enc_dtype=jnp.float32):
    """Full Attention.forward.  In a pointer-network decode loop, call
    encoder_transform once per sequence and decoder_transform + attention_step
    once per decode step."""
    enc_t = encoder_transform(encoder_outputs, w1, out_dtype=enc_dtype)
    dec_t = decoder_transform(decoder_state, w2)
    return attention_step(dec_t, enc_t, mask, vt)


def attention_reference(decoder_state, encoder_outputs, mask, w1, w2, vt):
    enc_t = jnp.einsum("bsh,oh->bso", encoder_outputs, w1)
    dec_t = jnp.einsum("bh,oh->bo", decoder_state, w2)
    u = jnp.einsum("bsh,oh->bso", jnp.tanh(enc_t + dec_t[:, None, :]), vt)[..., 0]
    # Same masking semantics as the kernel: large negative additive mask
    # (matches PyTorch log(mask+eps) at every valid position).
    masked = jnp.where(mask > 0, u, jnp.float32(-1e30))
    return jax.nn.log_softmax(masked, axis=-1)


if __name__ == "__main__":
    B, S, H = 2, 8, 32  # batch, encoder seq len, hidden_size

    key = jax.random.PRNGKey(0)
    k_enc, k_dec, k_dec2, k_m, k_w1, k_w2, k_vt = jax.random.split(key, 7)

    encoder_outputs = jax.random.normal(k_enc, (B, S, H), dtype=jnp.float32)
    decoder_state = jax.random.normal(k_dec, (B, H), dtype=jnp.float32)
    decoder_state2 = jax.random.normal(k_dec2, (B, H), dtype=jnp.float32)
    # binary mask over encoder positions (keep at least the first position valid)
    mask = (jax.random.uniform(k_m, (B, S)) > 0.3).astype(jnp.float32)
    mask = mask.at[:, 0].set(1.0)

    # nn.Linear(H, H, bias=False) weights: shape (out, in); vt: (1, H)
    bound = 1.0 / np.sqrt(H)
    w1 = jax.random.uniform(k_w1, (H, H), minval=-bound, maxval=bound, dtype=jnp.float32)
    w2 = jax.random.uniform(k_w2, (H, H), minval=-bound, maxval=bound, dtype=jnp.float32)
    vt = jax.random.uniform(k_vt, (1, H), minval=-bound, maxval=bound, dtype=jnp.float32)

    ref = attention_reference(decoder_state, encoder_outputs, mask, w1, w2, vt)

    # Full forward, f32 enc_t (matches the PyTorch module at tight tolerance).
    log_score = jax.block_until_ready(
        attention_forward(decoder_state, encoder_outputs, mask, w1, w2, vt))
    np.testing.assert_allclose(np.asarray(log_score), np.asarray(ref), rtol=1e-5, atol=1e-5)

    # Decode-step reuse: enc_t computed once, dec@W2^T + batched step kernel per step.
    enc_t = jax.block_until_ready(encoder_transform(encoder_outputs, w1))
    dec_t2 = decoder_transform(decoder_state2, w2)
    log_score2 = jax.block_until_ready(attention_step(dec_t2, enc_t, mask, vt))
    ref2 = attention_reference(decoder_state2, encoder_outputs, mask, w1, w2, vt)
    np.testing.assert_allclose(np.asarray(log_score2), np.asarray(ref2), rtol=1e-5, atol=1e-5)

    # Production option: bf16 enc_t halves the per-step HBM stream; tanh/softmax
    # stay f32 in-kernel, so only the enc_t quantization error remains.
    log_bf16 = jax.block_until_ready(
        attention_forward(decoder_state, encoder_outputs, mask, w1, w2, vt,
                          enc_dtype=jnp.bfloat16))
    np.testing.assert_allclose(np.asarray(log_bf16), np.asarray(ref), rtol=1e-2, atol=1e-2)

    print("KERNEL_OK")
</pallas_src>

<mosaic_0001>
module attributes {stable_mosaic.version = 11 : i64} {
  func.func @_linear_kernel(%arg0: i32, %arg1: memref<256x32xf32, #tpu.memory_space<vmem>>, %arg2: memref<32x32xf32, #tpu.memory_space<vmem>>, %arg3: memref<256x32xf32, #tpu.memory_space<vmem>>) attributes {dimension_semantics = [#tpu.dimension_semantics<parallel>], iteration_bounds = array<i64: 1>, scalar_prefetch = 0 : i64, scratch_operands = 0 : i64, tpu.core_type = #tpu.core_type<tc>, window_params = [{transform_indices = @transform_0, window_bounds = array<i64: 256, 32>}, {pipeline_mode = #tpu.pipeline_mode<synchronous>, transform_indices = @transform_1, window_bounds = array<i64: 32, 32>}, {transform_indices = @transform_2, window_bounds = array<i64: 256, 32>}]} {
    %c0 = arith.constant 0 : index
    %c0_0 = arith.constant 0 : index
    %0 = vector.load %arg1[%c0, %c0_0] : memref<256x32xf32, #tpu.memory_space<vmem>>, vector<256x32xf32>
    %c0_1 = arith.constant 0 : index
    %c0_2 = arith.constant 0 : index
    %1 = vector.load %arg2[%c0_1, %c0_2] : memref<32x32xf32, #tpu.memory_space<vmem>>, vector<32x32xf32>
    %cst = arith.constant dense<0.000000e+00> : vector<256x32xf32>
    %2 = tpu.matmul %0, %1, %cst {dimension_numbers = #tpu.dot_dimension_numbers<[1], [1], [0], [0], [0, 0, 1, 0], [], []>} : vector<256x32xf32>, vector<32x32xf32>, vector<256x32xf32> -> vector<256x32xf32>
    %c0_3 = arith.constant 0 : index
    %c0_4 = arith.constant 0 : index
    %3 = vector.load %arg3[%c0_3, %c0_4] : memref<256x32xf32, #tpu.memory_space<vmem>>, vector<256x32xf32>
    tpu.vector_store %arg3[%c0_3, %c0_4], %2 {strides = array<i32>} : memref<256x32xf32, #tpu.memory_space<vmem>>, vector<256x32xf32>,
    return
  }
  func.func @transform_0(%arg0: i32) -> (i32, i32) {
    %c0_i32 = arith.constant 0 : i32
    %c0_i32_0 = arith.constant 0 : i32
    return %arg0, %c0_i32 : i32, i32
  }
  func.func @transform_1(%arg0: i32) -> (i32, i32) {
    %c0_i32 = arith.constant 0 : i32
    %c0_i32_0 = arith.constant 0 : i32
    %c0_i32_1 = arith.constant 0 : i32
    return %c0_i32, %c0_i32_0 : i32, i32
  }
  func.func @transform_2(%arg0: i32) -> (i32, i32) {
    %c0_i32 = arith.constant 0 : i32
    %c0_i32_0 = arith.constant 0 : i32
    return %arg0, %c0_i32 : i32, i32
  }
}

</mosaic_0001>

<bundles_post_ra>
// kernel: tpu_custom_call.1
= control target key start
LH: loop header
LB: loop body
LE: loop exit
PB: predicated region body
PF: predicated region fallthrough
CT: control target
= control target key end

     0   :  { %vm47_vm0 = vcmask 261120   ;;  %s652_s1 = inlined_call_operand.vmem [shape: f32[32,32], index: 1, kind: input, shape index: {}]   ;;  %s653_s0 = inlined_call_operand.vmem [shape: f32[256,32], index: 0, kind: input, shape index: {}]   ;;  %s654_s2 = inlined_call_operand.vmem [shape: f32[256,32], index: 2, kind: output, shape index: {}]  }
   0x1   :  { %v46_v0 = vld [vmem:[%s652_s1 + $0x18] sm:$0xff]  ;;  %v45_v1 = vld [vmem:[%s652_s1 + $0x10] sm:$0xff]  ;;  %v44_v2 = vld [vmem:[%s652_s1 + $0x8] sm:$0xff] }
   0x2   :  { %342 = vmatpush.xpose.msk.msra.mxu2 %vm47_vm0, %v46_v0  ;;  %343 = vmatpush.xpose.msk.msra.mxu3 %vm47_vm0, %v46_v0  ;;  %v43_v3 = vld [vmem:[%s652_s1] sm:$0xff]  ;;  %v28_v8 = vld [vmem:[%s653_s0 + $0x88] sm:$0xff]  ;;  %v29_v12 = vld [vmem:[%s653_s0 + $0x90] sm:$0xff] }
   0x3   :  { %305 = vmatpush.xpose.msk.msra.mxu0 %vm47_vm0, %v46_v0  ;;  %341 = vmatpush.xpose.msk.msra.mxu1 %vm47_vm0, %v46_v0  ;;  %v27_v4 = vld [vmem:[%s653_s0 + $0x80] sm:$0xff]  ;;  %v36_v9 = vld [vmem:[%s653_s0 + $0xc8] sm:$0xff]  ;;  %v37_v13 = vld [vmem:[%s653_s0 + $0xd0] sm:$0xff] }
   0x4   :  { %v35_v5 = vld [vmem:[%s653_s0 + $0xc0] sm:$0xff]  ;;  %v12_v10 = vld [vmem:[%s653_s0 + $0x8] sm:$0xff]  ;;  %v13_v14 = vld [vmem:[%s653_s0 + $0x10] sm:$0xff] }
   0x5   :  { %v11_v6 = vld [vmem:[%s653_s0] sm:$0xff]  ;;  %v20_v11 = vld [vmem:[%s653_s0 + $0x48] sm:$0xff]  ;;  %v21_v15 = vld [vmem:[%s653_s0 + $0x50] sm:$0xff] }
   0x6   :  { %345 = vmatpush.xpose.msk.msra.mxu2 %vm47_vm0, %v45_v1  ;;  %346 = vmatpush.xpose.msk.msra.mxu3 %vm47_vm0, %v45_v1  ;;  %v19_v7 = vld [vmem:[%s653_s0 + $0x40] sm:$0xff]  ;;  %v30_v16 = vld [vmem:[%s653_s0 + $0x98] sm:$0xff]  ;;  %v32_v24 = vld [vmem:[%s653_s0 + $0xa8] sm:$0xff] }
   0x7   :  { %306 = vmatpush.xpose.msk.msra.mxu0 %vm47_vm0, %v45_v1  ;;  %344 = vmatpush.xpose.msk.msra.mxu1 %vm47_vm0, %v45_v1  ;;  %v38_v17 = vld [vmem:[%s653_s0 + $0xd8] sm:$0xff]  ;;  %v31_v20 = vld [vmem:[%s653_s0 + $0xa0] sm:$0xff]  ;;  %v40_v25 = vld [vmem:[%s653_s0 + $0xe8] sm:$0xff] }
   0x8   :  { %v14_v18 = vld [vmem:[%s653_s0 + $0x18] sm:$0xff]  ;;  %v39_v21 = vld [vmem:[%s653_s0 + $0xe0] sm:$0xff]  ;;  %v16_v26 = vld [vmem:[%s653_s0 + $0x28] sm:$0xff] }
   0x9   :  { %v22_v19 = vld [vmem:[%s653_s0 + $0x58] sm:$0xff]  ;;  %v15_v22 = vld [vmem:[%s653_s0 + $0x20] sm:$0xff]  ;;  %v24_v27 = vld [vmem:[%s653_s0 + $0x68] sm:$0xff] }
   0xa   :  { %348 = vmatpush.xpose.msk.msra.mxu2 %vm47_vm0, %v44_v2  ;;  %349 = vmatpush.xpose.msk.msra.mxu3 %vm47_vm0, %v44_v2  ;;  %v23_v23 = vld [vmem:[%s653_s0 + $0x60] sm:$0xff]  ;;  %v33_v28 = vld [vmem:[%s653_s0 + $0xb0] sm:$0xff]  ;;  %v34_v32 = vld [vmem:[%s653_s0 + $0xb8] sm:$0xff] }
   0xb   :  { %307 = vmatpush.xpose.msk.msra.mxu0 %vm47_vm0, %v44_v2  ;;  %347 = vmatpush.xpose.msk.msra.mxu1 %vm47_vm0, %v44_v2  ;;  %v41_v29 = vld [vmem:[%s653_s0 + $0xf0] sm:$0xff]  ;;  %v42_v33 = vld [vmem:[%s653_s0 + $0xf8] sm:$0xff] }
   0xc   :  { %v17_v30 = vld [vmem:[%s653_s0 + $0x30] sm:$0xff]  ;;  %v18_v34 = vld [vmem:[%s653_s0 + $0x38] sm:$0xff] }
   0xd   :  { %v25_v31 = vld [vmem:[%s653_s0 + $0x70] sm:$0xff]  ;;  %v26_v35 = vld [vmem:[%s653_s0 + $0x78] sm:$0xff] }
   0xe   :  { %351 = vmatpush.xpose.msk.msra.mxu2 %vm47_vm0, %v43_v3  ;;  %352 = vmatpush.xpose.msk.msra.mxu3 %vm47_vm0, %v43_v3 }
   0xf   :  { %308 = vmatpush.xpose.msk.msra.mxu0 %vm47_vm0, %v43_v3  ;;  %350 = vmatpush.xpose.msk.msra.mxu1 %vm47_vm0, %v43_v3 }
  0x11   :  { %325 = vmatmul.msk.f32.vlgmr.msra.gmra.mxu2 %vm47_vm0, %v27_v4  ;;  %333 = vmatmul.msk.f32.vlgmr.msra.gmra.mxu3 %vm47_vm0, %v35_v5 }
  0x12   :  { %309 = vmatmul.msk.f32.vlgmr.msra.gmra.mxu0 %vm47_vm0, %v11_v6  ;;  %317 = vmatmul.msk.f32.vlgmr.msra.gmra.mxu1 %vm47_vm0, %v19_v7 }
  0x19   :  { %326 = vmatmul.msk.f32.gmra.mxu2 %vm47_vm0, %v28_v8  ;;  %334 = vmatmul.msk.f32.gmra.mxu3 %vm47_vm0, %v36_v9 }
  0x1a   :  { %310 = vmatmul.msk.f32.gmra.mxu0 %vm47_vm0, %v12_v10  ;;  %318 = vmatmul.msk.f32.gmra.mxu1 %vm47_vm0, %v20_v11 }
  0x21   :  { %327 = vmatmul.msk.f32.gmra.mxu2 %vm47_vm0, %v29_v12  ;;  %335 = vmatmul.msk.f32.gmra.mxu3 %vm47_vm0, %v37_v13 }
  0x22   :  { %311 = vmatmul.msk.f32.gmra.mxu0 %vm47_vm0, %v13_v14  ;;  %319 = vmatmul.msk.f32.gmra.mxu1 %vm47_vm0, %v21_v15 }
  0x29   :  { %328 = vmatmul.msk.f32.gmra.mxu2 %vm47_vm0, %v30_v16  ;;  %336 = vmatmul.msk.f32.gmra.mxu3 %vm47_vm0, %v38_v17 }
  0x2a   :  { %312 = vmatmul.msk.f32.gmra.mxu0 %vm47_vm0, %v14_v18  ;;  %320 = vmatmul.msk.f32.gmra.mxu1 %vm47_vm0, %v22_v19 }
  0x31   :  { %329 = vmatmul.msk.f32.gmra.mxu2 %vm47_vm0, %v31_v20  ;;  %337 = vmatmul.msk.f32.gmra.mxu3 %vm47_vm0, %v39_v21 }
  0x32   :  { %313 = vmatmul.msk.f32.gmra.mxu0 %vm47_vm0, %v15_v22  ;;  %321 = vmatmul.msk.f32.gmra.mxu1 %vm47_vm0, %v23_v23 }
  0x39   :  { %330 = vmatmul.msk.f32.gmra.mxu2 %vm47_vm0, %v32_v24  ;;  %338 = vmatmul.msk.f32.gmra.mxu3 %vm47_vm0, %v40_v25 }
  0x3a   :  { %314 = vmatmul.msk.f32.gmra.mxu0 %vm47_vm0, %v16_v26  ;;  %322 = vmatmul.msk.f32.gmra.mxu1 %vm47_vm0, %v24_v27 }
  0x41   :  { %331 = vmatmul.msk.f32.gmra.mxu2 %vm47_vm0, %v33_v28  ;;  %339 = vmatmul.msk.f32.gmra.mxu3 %vm47_vm0, %v41_v29 }
  0x42   :  { %315 = vmatmul.msk.f32.gmra.mxu0 %vm47_vm0, %v17_v30  ;;  %323 = vmatmul.msk.f32.gmra.mxu1 %vm47_vm0, %v25_v31 }
  0x49   :  { %332 = vmatmul.msk.f32.gmra.mxu2 %vm47_vm0, %v34_v32  ;;  %340 = vmatmul.msk.f32.gmra.mxu3 %vm47_vm0, %v42_v33 }
  0x4a   :  { %316 = vmatmul.msk.f32.gmra.mxu0 %vm47_vm0, %v18_v34  ;;  %324 = vmatmul.msk.f32.gmra.mxu1 %vm47_vm0, %v26_v35 }
  0x8f   :  { %v173_v36 = vpop.f32.mrf.mxu0  ;;  %v197_v37 = vpop.f32.mrf.mxu1 }
  0x90   :  { %269 = vst.msk [vmem:[%s654_s2] sm:$0xff] %vm47_vm0, %v173_v36 }
  0x91   :  { %277 = vst.msk [vmem:[%s654_s2 + $0x40] sm:$0xff] %vm47_vm0, %v197_v37 }
  0x94   :  { %v221_v38 = vpop.f32.mrf.mxu2  ;;  %v245_v39 = vpop.f32.mrf.mxu3 }
  0x95   :  { %285 = vst.msk [vmem:[%s654_s2 + $0x80] sm:$0xff] %vm47_vm0, %v221_v38 }
  0x96   :  { %293 = vst.msk [vmem:[%s654_s2 + $0xc0] sm:$0xff] %vm47_vm0, %v245_v39 }
  0x97   :  { %v176_v40 = vpop.f32.mrf.mxu0  ;;  %v200_v41 = vpop.f32.mrf.mxu1 }
  0x98   :  { %270 = vst.msk [vmem:[%s654_s2 + $0x8] sm:$0xff] %vm47_vm0, %v176_v40 }
  0x99   :  { %278 = vst.msk [vmem:[%s654_s2 + $0x48] sm:$0xff] %vm47_vm0, %v200_v41 }
  0x9c   :  { %v224_v42 = vpop.f32.mrf.mxu2  ;;  %v248_v43 = vpop.f32.mrf.mxu3 }
  0x9d   :  { %286 = vst.msk [vmem:[%s654_s2 + $0x88] sm:$0xff] %vm47_vm0, %v224_v42 }
  0x9e   :  { %294 = vst.msk [vmem:[%s654_s2 + $0xc8] sm:$0xff] %vm47_vm0, %v248_v43 }
  0x9f   :  { %v179_v44 = vpop.f32.mrf.mxu0  ;;  %v203_v45 = vpop.f32.mrf.mxu1 }
  0xa0   :  { %271 = vst.msk [vmem:[%s654_s2 + $0x10] sm:$0xff] %vm47_vm0, %v179_v44 }
  0xa1   :  { %279 = vst.msk [vmem:[%s654_s2 + $0x50] sm:$0xff] %vm47_vm0, %v203_v45 }
  0xa4   :  { %v227_v46 = vpop.f32.mrf.mxu2  ;;  %v251_v47 = vpop.f32.mrf.mxu3 }
  0xa5   :  { %287 = vst.msk [vmem:[%s654_s2 + $0x90] sm:$0xff] %vm47_vm0, %v227_v46 }
  0xa6   :  { %295 = vst.msk [vmem:[%s654_s2 + $0xd0] sm:$0xff] %vm47_vm0, %v251_v47 }
  0xa7   :  { %v182_v48 = vpop.f32.mrf.mxu0  ;;  %v206_v49 = vpop.f32.mrf.mxu1 }
  0xa8   :  { %272 = vst.msk [vmem:[%s654_s2 + $0x18] sm:$0xff] %vm47_vm0, %v182_v48 }
  0xa9   :  { %280 = vst.msk [vmem:[%s654_s2 + $0x58] sm:$0xff] %vm47_vm0, %v206_v49 }
  0xac   :  { %v230_v50 = vpop.f32.mrf.mxu2  ;;  %v254_v51 = vpop.f32.mrf.mxu3 }
  0xad   :  { %288 = vst.msk [vmem:[%s654_s2 + $0x98] sm:$0xff] %vm47_vm0, %v230_v50 }
  0xae   :  { %296 = vst.msk [vmem:[%s654_s2 + $0xd8] sm:$0xff] %vm47_vm0, %v254_v51 }
  0xaf   :  { %v185_v52 = vpop.f32.mrf.mxu0  ;;  %v209_v53 = vpop.f32.mrf.mxu1 }
  0xb0   :  { %273 = vst.msk [vmem:[%s654_s2 + $0x20] sm:$0xff] %vm47_vm0, %v185_v52 }
  0xb1   :  { %281 = vst.msk [vmem:[%s654_s2 + $0x60] sm:$0xff] %vm47_vm0, %v209_v53 }
  0xb4   :  { %v233_v54 = vpop.f32.mrf.mxu2  ;;  %v257_v55 = vpop.f32.mrf.mxu3 }
  0xb5   :  { %289 = vst.msk [vmem:[%s654_s2 + $0xa0] sm:$0xff] %vm47_vm0, %v233_v54 }
  0xb6   :  { %297 = vst.msk [vmem:[%s654_s2 + $0xe0] sm:$0xff] %vm47_vm0, %v257_v55 }
  0xb7   :  { %v188_v56 = vpop.f32.mrf.mxu0  ;;  %v212_v57 = vpop.f32.mrf.mxu1 }
  0xb8   :  { %274 = vst.msk [vmem:[%s654_s2 + $0x28] sm:$0xff] %vm47_vm0, %v188_v56 }
  0xb9   :  { %282 = vst.msk [vmem:[%s654_s2 + $0x68] sm:$0xff] %vm47_vm0, %v212_v57 }
  0xbc   :  { %v236_v58 = vpop.f32.mrf.mxu2  ;;  %v260_v59 = vpop.f32.mrf.mxu3 }
  0xbd   :  { %290 = vst.msk [vmem:[%s654_s2 + $0xa8] sm:$0xff] %vm47_vm0, %v236_v58 }
  0xbe   :  { %298 = vst.msk [vmem:[%s654_s2 + $0xe8] sm:$0xff] %vm47_vm0, %v260_v59 }
  0xbf   :  { %v191_v60 = vpop.f32.mrf.mxu0  ;;  %v215_v61 = vpop.f32.mrf.mxu1 }
  0xc0   :  { %275 = vst.msk [vmem:[%s654_s2 + $0x30] sm:$0xff] %vm47_vm0, %v191_v60 }
  0xc1   :  { %283 = vst.msk [vmem:[%s654_s2 + $0x70] sm:$0xff] %vm47_vm0, %v215_v61 }
  0xc4   :  { %v239_v62 = vpop.f32.mrf.mxu2  ;;  %v263_v63 = vpop.f32.mrf.mxu3 }
  0xc5   :  { %291 = vst.msk [vmem:[%s654_s2 + $0xb0] sm:$0xff] %vm47_vm0, %v239_v62 }
  0xc6   :  { %299 = vst.msk [vmem:[%s654_s2 + $0xf0] sm:$0xff] %vm47_vm0, %v263_v63 }
  0xc7   :  { %v194_v0 = vpop.f32.mrf.mxu0  ;;  %v218_v1 = vpop.f32.mrf.mxu1 }
  0xc8   :  { %276 = vst.msk [vmem:[%s654_s2 + $0x38] sm:$0xff] %vm47_vm0, %v194_v0 }
  0xc9   :  { %284 = vst.msk [vmem:[%s654_s2 + $0x78] sm:$0xff] %vm47_vm0, %v218_v1 }
  0xcc   :  { %v242_v2 = vpop.f32.mrf.mxu2  ;;  %v266_v3 = vpop.f32.mrf.mxu3 }
  0xcd   :  { %292 = vst.msk [vmem:[%s654_s2 + $0xb8] sm:$0xff] %vm47_vm0, %v242_v2 }
  0xce   :  { %300 = vst.msk [vmem:[%s654_s2 + $0xf8] sm:$0xff] %vm47_vm0, %v266_v3 }

</bundles_post_ra>
